<compile_context>
chip_gen: v7x
topology: tpu7x:2x2x1
jax: 0.10.0
libtpu: 0.0.40
codegen_flags: <defaults>
</compile_context>

<pallas_src>
import jax
import jax.numpy as jnp
from jax import lax
from jax.experimental import pallas as pl
from jax.experimental.pallas import tpu as pltpu

_LANE = 128


def _round_up(x, m):
    return ((x + m - 1) // m) * m


def prepare_alloc_params(weight, bias=None, *, compute_dtype=jnp.bfloat16):
    """One-time parameter prep (hoisted out of the per-call path).

    weight: (T_out, T_in), PyTorch nn.Linear layout (out_features, in_features).
    bias:   accepted for API parity but intentionally unused -- softmax over dim 0
            is shift-invariant per column, so the bias cancels exactly.
    """
    del bias  # provably a no-op under softmax(axis=0)
    T_out, T_in = weight.shape
    T_out_pad = _round_up(T_out, _LANE)
    wt = jnp.zeros((T_in, T_out_pad), compute_dtype)
    wt = wt.at[:, :T_out].set(weight.T.astype(compute_dtype))
    return {"wt": wt, "t_out": T_out, "compute_dtype": compute_dtype}


def _alloc_kernel(mu_ref, wt_ref, out_ref):
    # mu_ref : (N, T_in)    full (grid-invariant) activation block
    # wt_ref : (T_in, TN)   pre-transposed weight slice for this 128k-lane chunk
    # out_ref: (N, TN)      softmax over axis 0 of (mu @ W^T) for this chunk
    y = lax.dot_general(
        mu_ref[...], wt_ref[...],
        dimension_numbers=(((1,), (0,)), ((), ())),
        preferred_element_type=jnp.float32,
    )
    m = jnp.max(y, axis=0, keepdims=True)          # (1, TN)
    e = jnp.exp(y - m)                             # (N, TN)
    s = jnp.sum(e, axis=0, keepdims=True)          # (1, TN)
    # EUP approximate reciprocal + one Newton step: ~f32-exact, off the VALU slot.
    r = pl.reciprocal(s, approx=True)
    r = r * (2.0 - s * r)
    out_ref[...] = (e * r).astype(out_ref.dtype)


def _pick_lane_block(N, T_in, T_out_pad, itemsize, lane_block):
    if lane_block is not None:
        tn = min(lane_block, T_out_pad)
        return tn if T_out_pad % tn == 0 else _LANE
    try:
        vmem_cap = pltpu.get_tpu_info().vmem_capacity_bytes
    except Exception:
        vmem_cap = 64 * 1024 * 1024  # conservative: v7x has 64 MiB per TC
    budget = vmem_cap // 2  # headroom for compiler scratch + pipeline buffers

    def footprint(tn):
        mu_b = N * T_in * itemsize          # invariant, single-buffered
        w_b = 2 * T_in * tn * itemsize      # double-buffered weight tile
        out_b = 2 * N * tn * 4              # double-buffered f32 output tile
        return mu_b + w_b + out_b

    cands = [c for c in (512, 256, 128)
             if T_out_pad % c == 0 and footprint(c) <= budget]
    if not cands:
        return _LANE
    # Prefer >= 2 grid steps (v7x megacore needs them), otherwise the largest tile.
    multi = [c for c in cands if T_out_pad // c >= 2]
    return (multi or cands)[0]


def alloc_forward(mu, params, *, lane_block=None, prefer_pallas=None):
    """softmax(mu @ weight.T [+ bias], axis=0); bias cancels under dim-0 softmax."""
    N, T_in = mu.shape
    wt = params["wt"]
    T_out = params["t_out"]
    T_out_pad = wt.shape[1]
    cdt = params["compute_dtype"]
    assert wt.shape[0] == T_in

    mu_c = mu.astype(cdt)
    if prefer_pallas is None:
        # Single-vreg-wide output: a standalone custom call is pure launch overhead;
        # let XLA fuse it unless the caller forces the Pallas path.
        prefer_pallas = T_out_pad > _LANE
    if not prefer_pallas:
        y = jnp.dot(mu_c, wt, preferred_element_type=jnp.float32)[:, :T_out]
        return jax.nn.softmax(y, axis=0)

    itemsize = jnp.dtype(cdt).itemsize
    tn = _pick_lane_block(N, T_in, T_out_pad, itemsize, lane_block)
    grid = (T_out_pad // tn,)

    mu_spec_kwargs = {}
    if grid[0] > 1:
        # mu's block index never changes across the grid: no need to double-buffer.
        mu_spec_kwargs["pipeline_mode"] = pl.Buffered(1)
    mu_spec = pl.BlockSpec((N, T_in), lambda j: (0, 0), **mu_spec_kwargs)

    footprint = N * T_in * itemsize + 2 * T_in * tn * itemsize + 2 * N * tn * 4
    vmem_limit = None
    if footprint > 24 * 1024 * 1024:  # above the ~32 MiB default scoped limit (w/ margin)
        vmem_limit = int(footprint * 1.5)

    cost = pl.CostEstimate(
        flops=2 * N * T_in * T_out_pad + 6 * N * T_out_pad,
        transcendentals=N * T_out_pad,
        bytes_accessed=N * T_in * itemsize + T_in * T_out_pad * itemsize
        + N * T_out_pad * 4,
    )

    out = pl.pallas_call(
        _alloc_kernel,
        out_shape=jax.ShapeDtypeStruct((N, T_out_pad), jnp.float32),
        grid=grid,
        in_specs=[
            mu_spec,                                     # full mu each chunk
            pl.BlockSpec((T_in, tn), lambda j: (0, j)),  # weight cols for this chunk
        ],
        out_specs=pl.BlockSpec((N, tn), lambda j: (0, j)),
        compiler_params=pltpu.CompilerParams(
            dimension_semantics=("parallel",),  # independent lane chunks
            vmem_limit_bytes=vmem_limit,
        ),
        cost_estimate=cost,
    )(mu_c, wt)

    # TODO(synk): for very large N, add an "arbitrary" grid axis over batch tiles
    # with an online (running max/sum) softmax in VMEM scratch so the full (N, T)
    # slab need not be resident; current design keeps the whole batch in one block.
    return out if T_out == T_out_pad else out[:, :T_out]


if __name__ == "__main__":
    # Small, deterministic setup: batch N=8, num_tasks T=32
    N, T = 8, 32
    key = jax.random.PRNGKey(0)
    k_mu, k_w, k_b = jax.random.split(key, 3)

    mu = jax.random.normal(k_mu, (N, T), dtype=jnp.float32)
    # nn.Linear default init: U(-1/sqrt(in), 1/sqrt(in))
    bound = 1.0 / jnp.sqrt(jnp.float32(T))
    weight = jax.random.uniform(k_w, (T, T), jnp.float32, minval=-bound, maxval=bound)
    bias = jax.random.uniform(k_b, (T,), jnp.float32, minval=-bound, maxval=bound)

    params = prepare_alloc_params(weight, bias)            # one-time prep
    out = alloc_forward(mu, params, prefer_pallas=True)    # force the Pallas path
    out = jax.block_until_ready(out)
    assert out.shape == (N, T)

    # Reference with the SAME bf16-rounded inputs (isolates kernel numerics).
    mu_c = mu.astype(jnp.bfloat16).astype(jnp.float32)
    w_c = weight.astype(jnp.bfloat16).astype(jnp.float32)
    ref_same = jax.nn.softmax(mu_c @ w_c.T + bias, axis=0)
    assert jnp.allclose(out, ref_same, atol=2e-5, rtol=1e-4), "mismatch vs same-precision ref"

    # Full-f32 PyTorch-semantics reference (bias included); loose tol for bf16 matmul.
    ref_f32 = jax.nn.softmax(mu @ weight.T + bias, axis=0)
    assert jnp.allclose(out, ref_f32, atol=1e-2), "mismatch vs f32 reference"

    # softmax over dim=0: every column sums to 1.
    assert jnp.allclose(jnp.sum(out, axis=0), jnp.ones((T,)), atol=1e-5)

    print("KERNEL_OK")
</pallas_src>

<mosaic_0001>
module attributes {stable_mosaic.version = 11 : i64} {
  func.func @_alloc_kernel(%arg0: i32, %arg1: memref<8x32xbf16, #tpu.memory_space<vmem>>, %arg2: memref<32x128xbf16, #tpu.memory_space<vmem>>, %arg3: memref<8x128xf32, #tpu.memory_space<vmem>>) attributes {dimension_semantics = [#tpu.dimension_semantics<parallel>], iteration_bounds = array<i64: 1>, scalar_prefetch = 0 : i64, scratch_operands = 0 : i64, tpu.core_type = #tpu.core_type<tc>, window_params = [{pipeline_mode = #tpu.pipeline_mode<synchronous>, transform_indices = @transform_0, window_bounds = array<i64: 8, 32>}, {transform_indices = @transform_1, window_bounds = array<i64: 32, 128>}, {transform_indices = @transform_2, window_bounds = array<i64: 8, 128>}]} {
    %c0 = arith.constant 0 : index
    %c0_0 = arith.constant 0 : index
    %0 = vector.load %arg1[%c0, %c0_0] : memref<8x32xbf16, #tpu.memory_space<vmem>>, vector<8x32xbf16>
    %c0_1 = arith.constant 0 : index
    %c0_2 = arith.constant 0 : index
    %1 = vector.load %arg2[%c0_1, %c0_2] : memref<32x128xbf16, #tpu.memory_space<vmem>>, vector<32x128xbf16>
    %cst = arith.constant dense<0.000000e+00> : vector<8x128xf32>
    %2 = tpu.matmul %0, %1, %cst {dimension_numbers = #tpu.dot_dimension_numbers<[1], [0], [0], [1], [0, 0, 1, 1], [], []>} : vector<8x32xbf16>, vector<32x128xbf16>, vector<8x128xf32> -> vector<8x128xf32>
    %cst_3 = arith.constant dense<0xFF800000> : vector<128xf32>
    %3 = vector.multi_reduction <maximumf>, %2, %cst_3 [0] : vector<8x128xf32> to vector<128xf32>
    %4 = vector.shape_cast %3 : vector<128xf32> to vector<1x128xf32>
    %5 = vector.broadcast %4 : vector<1x128xf32> to vector<8x128xf32>
    %6 = arith.subf %2, %5 : vector<8x128xf32>
    %7 = math.exp %6 : vector<8x128xf32>
    %cst_4 = arith.constant dense<0.000000e+00> : vector<128xf32>
    %8 = vector.multi_reduction <add>, %7, %cst_4 [0] : vector<8x128xf32> to vector<128xf32>
    %9 = vector.shape_cast %8 : vector<128xf32> to vector<1x128xf32>
    %10 = tpu.reciprocal %9 {approx = true} : vector<1x128xf32> -> vector<1x128xf32>
    %11 = arith.mulf %9, %10 : vector<1x128xf32>
    %cst_5 = arith.constant 2.000000e+00 : f32
    %12 = vector.broadcast %cst_5 : f32 to vector<1x128xf32>
    %13 = arith.subf %12, %11 : vector<1x128xf32>
    %14 = arith.mulf %10, %13 : vector<1x128xf32>
    %15 = vector.broadcast %14 : vector<1x128xf32> to vector<8x128xf32>
    %16 = arith.mulf %7, %15 : vector<8x128xf32>
    %c0_6 = arith.constant 0 : index
    %c0_7 = arith.constant 0 : index
    %17 = vector.load %arg3[%c0_6, %c0_7] : memref<8x128xf32, #tpu.memory_space<vmem>>, vector<8x128xf32>
    tpu.vector_store %arg3[%c0_6, %c0_7], %16 {strides = array<i32>} : memref<8x128xf32, #tpu.memory_space<vmem>>, vector<8x128xf32>,
    return
  }
  func.func @transform_0(%arg0: i32) -> (i32, i32) {
    %c0_i32 = arith.constant 0 : i32
    %c0_i32_0 = arith.constant 0 : i32
    %c0_i32_1 = arith.constant 0 : i32
    return %c0_i32, %c0_i32_0 : i32, i32
  }
  func.func @transform_1(%arg0: i32) -> (i32, i32) {
    %c0_i32 = arith.constant 0 : i32
    %c0_i32_0 = arith.constant 0 : i32
    return %c0_i32, %arg0 : i32, i32
  }
  func.func @transform_2(%arg0: i32) -> (i32, i32) {
    %c0_i32 = arith.constant 0 : i32
    %c0_i32_0 = arith.constant 0 : i32
    return %c0_i32, %arg0 : i32, i32
  }
}

</mosaic_0001>

<bundles_post_ra>
// kernel: tpu_custom_call.1
= control target key start
LH: loop header
LB: loop body
LE: loop exit
PB: predicated region body
PF: predicated region fallthrough
CT: control target
= control target key end

     0   :  { %7 = vsyncpa [#allocation3], 0  ;;  %s301_s0 = inlined_call_operand.hbm [shape: bf16[8,32], index: 0, kind: input, shape index: {}]   ;;  %s302_s1 = inlined_call_operand.hbm [shape: bf16[32,128], index: 1, kind: input, shape index: {}]   ;;  %s303_s2 = inlined_call_operand.hbm [shape: f32[8,128], index: 2, kind: output, shape index: {}]  }
   0x1   :  { %8 = vsyncpa [#allocation6], 0 }
   0x2   :  { %9 = vsyncpa [#allocation4], 0  ;;  %s236_s9 = smov [#allocation2]   ;;  %s237_s11 = smov [#allocation5]  }
   0x3   :  { %s16_s10 = sshll.u32 %s236_s9, 4  ;;  %s25_s12 = sshll.u32 %s237_s11, 4  ;;  %s17_s10 = int_to_ptr.vmem [resolvable:$true] %s16_s10  ;;  %s258_s12 = int_to_ptr.vmem [resolvable:$true] %s25_s12 }
   0x4   :  { %s164_s15 = scalar_lea.hbm %s301_s0, 64 }
   0x5   :  { %p165_p0 = scmp.ne.s32.totalorder %s301_s0, %s164_s15  ;;  %p168_p1 = scmp.lt.u32.totalorder %s164_s15, %s301_s0 }
   0x7   :  { %p170_p2 = pnand %p168_p1, %p165_p0 }
   0x9   :  { %173 = shalt.err (!%p170_p2)
}
   0xa   :  { %s174_s20 = scalar_lea.vmem %s17_s10, 64  ;;  %p179_p4 = scmp.lt.s32.totalorder %s17_s10, %s17_s10 }
   0xb   :  { %p175_p3 = scmp.ne.s32.totalorder %s17_s10, %s174_s20  ;;  %p180_p5 = scmp.lt.s32.totalorder %s174_s20, %s174_s20 }
   0xd   :  { %p181_p6 = por %p180_p5, %p179_p4 }
   0xf   :  { %p182_p7 = pnand %p181_p6, %p175_p3 }
  0x11   :  { %185 = shalt.err (!%p182_p7)
}
  0x12   :  { %19 = dma.hbm_to_vmem [thread:$0]  %s301_s0, 64, %s17_s10, [#allocation3]  }
  0x13   :  { %s186_s25 = scalar_lea.hbm %s302_s1, 256 }
  0x14   :  { %p187_p8 = scmp.ne.s32.totalorder %s302_s1, %s186_s25  ;;  %p190_p9 = scmp.lt.u32.totalorder %s186_s25, %s302_s1 }
  0x16   :  { %p192_p10 = pnand %p190_p9, %p187_p8 }
  0x18   :  { %195 = shalt.err (!%p192_p10)
}
  0x19   :  { %s196_s30 = scalar_lea.vmem %s258_s12, 256  ;;  %p201_p12 = scmp.lt.s32.totalorder %s258_s12, %s258_s12 }
  0x1a   :  { %p197_p11 = scmp.ne.s32.totalorder %s258_s12, %s196_s30  ;;  %p202_p13 = scmp.lt.s32.totalorder %s196_s30, %s196_s30 }
  0x1c   :  { %p203_p0 = por %p202_p13, %p201_p12 }
  0x1e   :  { %p204_p1 = pnand %p203_p0, %p197_p11 }
  0x20   :  { %207 = shalt.err (!%p204_p1)
}
  0x21   :  { %s238_s0 = smov 64   ;;  %s239_s3 = smov 4  }
  0x22   :  { %31 = dma.hbm_to_vmem [thread:$0]  %s302_s1, 256, %s258_s12, [#allocation6], %s238_s0, %s238_s0, %s239_s3  }
  0x23   :  { %230 = dma.done.wait [#allocation3], 64  }
  0x24   :  { %231 = vsyncadd [#allocation3], 4294967232 }
  0x25   :  { %232 = dma.done.wait [#allocation6], 256  }
  0x26   :  { %233 = vsyncadd [#allocation6], 4294967040  ;;  %v240_v0 = vmov 0.0   ;;  %vm241_vm0 = vmmov 0   ;;  %v158_v1 = vld [vmem:[#allocation5] sm:$0xff]   ;;  %v159_v2 = vld [vmem:[#allocation5 + $0x8] sm:$0xff]  }
  0x27   :  { %143 = vmatprep.subr.bf16.mxu0 %v240_v0  ;;  %147 = vmatprep.mubr.msk.bf16.mxu0 %vm241_vm0, %v240_v0  ;;  %v39_v3 = vld [vmem:[#allocation2] sm:$0xf]  ;;  %vm56_vm1 = vcmask 261120   ;;  %s242_s1 = smov [#allocation7]  }
  0x28   :  { %144 = vmatpush3.bf16.msra.mxu0 %v158_v1  ;;  %s127_s6 = sshll.u32 %s242_s1, 4  ;;  %s128_s6 = int_to_ptr.vmem [resolvable:$true] %s127_s6 }
  0x29   :  { %145 = vmatprep.subr.bf16.mxu0 %v240_v0  ;;  %s208_s7 = scalar_lea.vmem %s128_s6, 128  ;;  %p213_p3 = scmp.lt.s32.totalorder %s128_s6, %s128_s6 }
  0x2a   :  { %p209_p2 = scmp.ne.s32.totalorder %s128_s6, %s208_s7  ;;  %p214_p4 = scmp.lt.s32.totalorder %s208_s7, %s208_s7 }
  0x2c   :  { %146 = vmatpush3.bf16.msra.mxu0 %v159_v2  ;;  %p215_p5 = por %p214_p4, %p213_p3 }
  0x2e   :  { %p216_p6 = pnand %p215_p5, %p209_p2 }
  0x2f   :  { %148 = vmatmul.mubr.msk.bf16.vlgmr.msra.gmra.mrb[0].mxu0 %vm56_vm1, %v39_v3 }
 0x102   :  { %v94_v4 = vpop.f32.mrb[0].mxu0 }
 0x103   :  { %v100_v5 = vrot.slane %v94_v4, 4  ;;  %v149_v6 = vpop.f32.mrb[1].mxu0 }
 0x104   :  { %v97_v7 = vpop.f32.mrb[2].mxu0 }
 0x105   :  { %v101_v8 = vmax.f32 %v94_v4, %v100_v5  ;;  %v150_v9 = vpop.f32.mrb[3].mxu0 }
 0x107   :  { %v102_v10 = vrot.slane %v101_v8, 2 }
 0x109   :  { %v103_v11 = vmax.f32 %v101_v8, %v102_v10 }
 0x10b   :  { %v104_v12 = vrot.slane %v103_v11, 1 }
 0x10d   :  { %v105_v13 = vmax.f32 %v103_v11, %v104_v12 }
 0x10f   :  { %v106_v14 = vsub.f32 %v94_v4, %v105_v13 }
 0x111   :  { %v107_v15 = vmul.f32 1.442695, %v106_v14 }
 0x113   :  { %160 = vpow2.f32 %v107_v15 }
 0x11d   :  { %v161_v16 = vpop.eup %160 }
 0x11e   :  { %v109_v17 = vrot.slane %v161_v16, 4 }
 0x120   :  { %v110_v18 = vadd.f32 %v161_v16, %v109_v17 }
 0x122   :  { %v111_v19 = vrot.slane %v110_v18, 2 }
 0x124   :  { %v112_v20 = vadd.f32 %v111_v19, %v110_v18 }
 0x126   :  { %v113_v21 = vrot.slane %v112_v20, 1 }
 0x128   :  { %v114_v22 = vadd.f32 %v113_v21, %v112_v20 }
 0x12a   :  { %162 = vrcp.f32 %v114_v22 }
 0x134   :  { %v163_v23 = vpop.eup %162 }
 0x135   :  { %v116_v24 = vmul.f32 %v163_v23, %v114_v22 }
 0x137   :  { %v117_v25 = vsub.f32 2.0, %v116_v24 }
 0x139   :  { %v118_v26 = vmul.f32 %v163_v23, %v117_v25 }
 0x13b   :  { %v119_v27 = vmul.f32 %v161_v16, %v118_v26 }
 0x13d   :  { %120 = vst [vmem:[#allocation7] sm:$0xff] %v119_v27 }
 0x13e   :  { %219 = shalt.err (!%p216_p6)
}
 0x13f   :  { %s220_s10 = scalar_lea.hbm %s303_s2, 128 }
 0x140   :  { %p221_p7 = scmp.ne.s32.totalorder %s303_s2, %s220_s10  ;;  %p224_p8 = scmp.lt.u32.totalorder %s220_s10, %s303_s2 }
 0x142   :  { %p226_p9 = pnand %p224_p8, %p221_p7 }
 0x144   :  { %229 = shalt.err (!%p226_p9)
}
 0x145   :  { %130 = dma.vmem_to_hbm [thread:$0]  %s128_s6, 128, %s303_s2, [#allocation4]  }
 0x146   :  { %234 = dma.done.wait [#allocation4], 128  }
 0x147   :  { %235 = vsyncadd [#allocation4], 4294967168 }
 0x148   :  { %134 = vsyncpa [#allocation3], 1 }
 0x149   :  { %135 = vsyncpa [#allocation6], 1 }
 0x14a   :  { %136 = vsyncpa [#allocation4], 1 }

</bundles_post_ra>
